<compile_context>
chip_gen: v6e
topology: v6e:2x2x1
jax: 0.10.0
libtpu: 0.0.40
codegen_flags: <defaults>
</compile_context>

<pallas_src>
import functools

import jax
import jax.numpy as jnp
from jax.experimental import pallas as pl
from jax.experimental.pallas import tpu as pltpu


def _round_up(x, m):
    return -(-x // m) * m


def _layernorm_epilogue(z, scale, shift, o_ref, *, eps, d_true):
    """Custom LayerNorm: scale * (z - mean) / (std_unbiased + eps + |shift|)."""
    mean = jnp.sum(z, axis=-1, keepdims=True) * (1.0 / d_true)
    centered = z - mean
    if z.shape[-1] != d_true:
        # Padded lanes of z are exactly zero (zero-padded W2 cols / b2 /
        # residual), so the raw sum above already equals the true-lane sum;
        # only the variance needs an explicit mask.
        lane = jax.lax.broadcasted_iota(jnp.int32, z.shape, 1)
        centered = jnp.where(lane < d_true, centered, 0.0)
    var_unbiased = (jnp.sum(centered * centered, axis=-1, keepdims=True)
                    * (1.0 / (d_true - 1)))
    div = jnp.sqrt(var_unbiased) + eps + jnp.abs(shift)
    o_ref[...] = (scale * centered * pl.reciprocal(div, approx=True)
                  ).astype(o_ref.dtype)


def ffn_kernel_resident(x_ref, res_ref, w1_ref, b1_ref, w2_ref, b2_ref,
                        scale_ref, shift_ref, o_ref, *, eps, d_true, mm_dtype):
    """Weights fully VMEM-resident: one grid axis over row tiles, no scratch."""
    # bf16 MXU operands (in-register cast), f32 accumulation.
    h = jnp.dot(x_ref[...].astype(mm_dtype), w1_ref[...],
                preferred_element_type=jnp.float32)
    h = jnp.maximum(h + b1_ref[...], 0.0)
    y = jnp.dot(h.astype(mm_dtype), w2_ref[...],
                preferred_element_type=jnp.float32)
    z = y + b2_ref[...] + res_ref[...].astype(jnp.float32)
    _layernorm_epilogue(z, scale_ref[...], shift_ref[...], o_ref,
                        eps=eps, d_true=d_true)


def ffn_kernel_ktiled(x_ref, res_ref, w1_ref, b1_ref, w2_ref, b2_ref,
                      scale_ref, shift_ref, o_ref, acc_ref,
                      *, eps, d_true, mm_dtype):
    """Fallback for very large weights: hidden dim tiled on an arbitrary axis."""
    k = pl.program_id(1)

    @pl.when(k == 0)
    def _init():
        acc_ref[...] = jnp.zeros_like(acc_ref)

    h = jnp.dot(x_ref[...].astype(mm_dtype), w1_ref[...],
                preferred_element_type=jnp.float32)
    h = jnp.maximum(h + b1_ref[...], 0.0)
    acc_ref[...] += jnp.dot(h.astype(mm_dtype), w2_ref[...],
                            preferred_element_type=jnp.float32)

    @pl.when(k == pl.num_programs(1) - 1)
    def _finalize():
        z = acc_ref[...] + b2_ref[...] + res_ref[...].astype(jnp.float32)
        _layernorm_epilogue(z, scale_ref[...], shift_ref[...], o_ref,
                            eps=eps, d_true=d_true)


def _vmem_budget_bytes():
    """~80% of this generation's VMEM (leaves compiler/internal headroom)."""
    cap = None
    try:
        cap = int(pltpu.get_tpu_info().vmem_capacity_bytes)
    except Exception:
        cap = None
    if not cap or cap <= 0:
        cap = 64 << 20          # conservative fallback (v7x per-TensorCore)
    return max(int(cap * 0.8), 32 << 20)


def position_wise_feed_forward(x, residual_x, params, *, eps=1e-6,
                               tm=None, matmul_dtype=jnp.bfloat16):
    """x, residual_x: [B, S, D]. params: dict of w1, b1, w2, b2, scale, shift."""
    B, S, D = x.shape
    H = params["w1"].shape[1]
    M = B * S
    out_dtype = x.dtype

    # Lane-dense padding of feature dims (multiples of 128: unmasked vst,
    # full MXU lanes).  Padded lanes are zero-filled so they contribute
    # nothing; the LayerNorm masks them and uses the true D.
    Dp = _round_up(D, 128)
    Hp = _round_up(H, 128)

    w1 = jnp.pad(params["w1"].astype(matmul_dtype), ((0, Dp - D), (0, Hp - H)))
    w2 = jnp.pad(params["w2"].astype(matmul_dtype), ((0, Hp - H), (0, Dp - D)))
    b1 = jnp.pad(params["b1"].astype(jnp.float32), (0, Hp - H)).reshape(1, Hp)
    b2 = jnp.pad(params["b2"].astype(jnp.float32), (0, Dp - D)).reshape(1, Dp)
    scale = jnp.pad(params["scale"].astype(jnp.float32), (0, Dp - D)).reshape(1, Dp)
    shift = jnp.pad(params["shift"].astype(jnp.float32), (0, Dp - D)).reshape(1, Dp)

    # x / residual stay in their original dtype; the kernel casts in-register.
    x2 = x.reshape(M, D)
    r2 = residual_x.reshape(M, D)

    in_b = jnp.dtype(x.dtype).itemsize
    res_b = jnp.dtype(residual_x.dtype).itemsize
    out_b = jnp.dtype(out_dtype).itemsize
    mm_b = jnp.dtype(matmul_dtype).itemsize

    budget = _vmem_budget_bytes()

    # VMEM accounting (default double-buffering on every pipelined input).
    def fixed_bytes(th):
        return 2 * ((Dp * th + th * Dp) * mm_b   # W1 / W2 slices
                    + th * 4                     # b1 slice
                    + 3 * Dp * 4)                # b2 / scale / shift
    per_row = Dp * (2 * in_b + 2 * res_b + 2 * out_b + 4)  # x, res, out, acc

    # Hidden tile: prefer th == Hp (weights fully resident, single pass over
    # the weights for the whole problem); otherwise the largest 128-multiple
    # divisor of Hp that still leaves room for a reasonable row tile.
    min_rows = min(256, _round_up(M, 8))
    th = 128
    for cand in range(Hp, 0, -128):
        if Hp % cand != 0:
            continue
        if fixed_bytes(cand) + per_row * min_rows <= budget:
            th = cand
            break

    # Row tile: as large as the budget allows (amortizes per-step overhead and,
    # in the k-tiled fallback, the weight re-streaming factor), generation-aware
    # cap, >= 2 tiles on the "parallel" axis for v7x's two TensorCores.
    if tm is None:
        tm_cap = 2048 if budget >= (80 << 20) else 1024
        tm_fit = (budget - fixed_bytes(th)) // per_row
        tm = max(8, min(tm_cap, int(tm_fit)))
        tm = (tm // 8) * 8
        tm = min(tm, _round_up(M, 8))
        if M > 8 and -(-M // tm) < 2:
            tm = _round_up(-(-M // 2), 8)
    assert tm % 8 == 0 and Hp % th == 0

    Mp = _round_up(M, tm)
    pads = ((0, Mp - M), (0, Dp - D))
    x2 = jnp.pad(x2, pads)
    r2 = jnp.pad(r2, pads)

    nm = Mp // tm
    nk = Hp // th

    if nk == 1:
        # Weight-resident path: 1-D grid over row tiles, no accumulator scratch.
        row = lambda i: (i, 0)
        zero = lambda i: (0, 0)
        grid = (nm,)
        in_specs = [
            pl.BlockSpec((tm, Dp), row),        # x tile
            pl.BlockSpec((tm, Dp), row),        # residual tile
            pl.BlockSpec((Dp, Hp), zero),       # W1 (resident)
            pl.BlockSpec((1, Hp), zero),        # b1
            pl.BlockSpec((Hp, Dp), zero),       # W2 (resident)
            pl.BlockSpec((1, Dp), zero),        # b2
            pl.BlockSpec((1, Dp), zero),        # scale
            pl.BlockSpec((1, Dp), zero),        # shift
        ]
        out_spec = pl.BlockSpec((tm, Dp), row)
        scratch = []
        kern = functools.partial(ffn_kernel_resident, eps=eps, d_true=D,
                                 mm_dtype=matmul_dtype)
        dims = ("parallel",)
        weight_passes = 1
    else:
        # k-tiled fallback (weights too large to be resident).
        row = lambda i, k: (i, 0)
        zero = lambda i, k: (0, 0)
        grid = (nm, nk)
        in_specs = [
            pl.BlockSpec((tm, Dp), row),                   # x tile
            pl.BlockSpec((tm, Dp), row),                   # residual tile
            pl.BlockSpec((Dp, th), lambda i, k: (0, k)),   # W1 slice
            pl.BlockSpec((1, th), lambda i, k: (0, k)),    # b1 slice
            pl.BlockSpec((th, Dp), lambda i, k: (k, 0)),   # W2 slice
            pl.BlockSpec((1, Dp), zero),                   # b2
            pl.BlockSpec((1, Dp), zero),                   # scale
            pl.BlockSpec((1, Dp), zero),                   # shift
        ]
        out_spec = pl.BlockSpec((tm, Dp), row)
        scratch = [pltpu.VMEM((tm, Dp), jnp.float32)]
        kern = functools.partial(ffn_kernel_ktiled, eps=eps, d_true=D,
                                 mm_dtype=matmul_dtype)
        dims = ("parallel", "arbitrary")
        weight_passes = nm   # re-streamed once per row tile

    cost = pl.CostEstimate(
        flops=4 * Mp * Dp * Hp,
        transcendentals=2 * Mp,
        bytes_accessed=int(Mp * Dp * (in_b + res_b + out_b)
                           + weight_passes * 2 * Dp * Hp * mm_b
                           + (Hp + 3 * Dp) * 4),
    )

    out = pl.pallas_call(
        kern,
        out_shape=jax.ShapeDtypeStruct((Mp, Dp), out_dtype),
        grid_spec=pltpu.PrefetchScalarGridSpec(
            num_scalar_prefetch=0,
            grid=grid,
            in_specs=in_specs,
            out_specs=out_spec,
            scratch_shapes=scratch,
        ),
        compiler_params=pltpu.CompilerParams(
            dimension_semantics=dims,
            vmem_limit_bytes=int(budget)),
        cost_estimate=cost,
    )(x2, r2, w1, b1, w2, b2, scale, shift)

    return out[:M, :D].reshape(B, S, D)


def reference_jax(x, residual_x, params, eps=1e-6, matmul_dtype=jnp.bfloat16):
    cd = matmul_dtype
    h = jnp.dot(x.astype(cd), params["w1"].astype(cd),
                preferred_element_type=jnp.float32) + params["b1"]
    h = jnp.maximum(h, 0.0)
    y = jnp.dot(h.astype(cd), params["w2"].astype(cd),
                preferred_element_type=jnp.float32) + params["b2"]
    z = y + residual_x
    d = z.shape[-1]
    mean = jnp.mean(z, axis=-1, keepdims=True)
    std = jnp.sqrt(jnp.sum((z - mean) ** 2, axis=-1, keepdims=True) / (d - 1))
    div = std + eps + jnp.abs(params["shift"])
    return params["scale"] * (z - mean) / div


if __name__ == "__main__":
    B, S, D, H = 2, 8, 32, 64   # batch, seq, embed_dim, output_dim (hidden)

    key = jax.random.PRNGKey(0)
    kx, kr, kw1, kb1, kw2, kb2 = jax.random.split(key, 6)

    x = jax.random.normal(kx, (B, S, D), dtype=jnp.float32)
    residual_x = jax.random.normal(kr, (B, S, D), dtype=jnp.float32)

    # Deterministic parameter init (uniform, roughly matching nn.Linear scale).
    params = {
        "w1": jax.random.uniform(kw1, (D, H), jnp.float32, -1.0, 1.0) / jnp.sqrt(D),
        "b1": jax.random.uniform(kb1, (H,), jnp.float32, -1.0, 1.0) / jnp.sqrt(D),
        "w2": jax.random.uniform(kw2, (H, D), jnp.float32, -1.0, 1.0) / jnp.sqrt(H),
        "b2": jax.random.uniform(kb2, (D,), jnp.float32, -1.0, 1.0) / jnp.sqrt(H),
        "scale": jnp.ones((D,), jnp.float32),   # LayerNorm scale init = ones
        "shift": jnp.zeros((D,), jnp.float32),  # LayerNorm shift init = zeros
    }

    out = position_wise_feed_forward(x, residual_x, params)
    out = jax.block_until_ready(out)

    # Reference uses the same bf16 matmul operands / f32 accumulation; the
    # remaining tolerance covers the approx (EUP) reciprocal in the epilogue.
    ref = reference_jax(x, residual_x, params)
    assert out.shape == (B, S, D)
    assert jnp.allclose(out, ref, atol=1e-2, rtol=1e-2), "mismatch vs reference"

    print("KERNEL_OK")
</pallas_src>

<mosaic_0001>
module attributes {stable_mosaic.version = 11 : i64} {
  func.func @ffn_kernel_resident(%arg0: i32, %arg1: memref<8x128xf32, #tpu.memory_space<vmem>>, %arg2: memref<8x128xf32, #tpu.memory_space<vmem>>, %arg3: memref<128x128xbf16, #tpu.memory_space<vmem>>, %arg4: memref<1x128xf32, #tpu.memory_space<vmem>>, %arg5: memref<128x128xbf16, #tpu.memory_space<vmem>>, %arg6: memref<1x128xf32, #tpu.memory_space<vmem>>, %arg7: memref<1x128xf32, #tpu.memory_space<vmem>>, %arg8: memref<1x128xf32, #tpu.memory_space<vmem>>, %arg9: memref<8x128xf32, #tpu.memory_space<vmem>>) attributes {dimension_semantics = [#tpu.dimension_semantics<parallel>], iteration_bounds = array<i64: 2>, scalar_prefetch = 0 : i64, scratch_operands = 0 : i64, tpu.core_type = #tpu.core_type<tc>, window_params = [{transform_indices = @transform_0, window_bounds = array<i64: 8, 128>}, {transform_indices = @transform_1, window_bounds = array<i64: 8, 128>}, {pipeline_mode = #tpu.pipeline_mode<synchronous>, transform_indices = @transform_2, window_bounds = array<i64: 128, 128>}, {pipeline_mode = #tpu.pipeline_mode<synchronous>, transform_indices = @transform_3, window_bounds = array<i64: 1, 128>}, {pipeline_mode = #tpu.pipeline_mode<synchronous>, transform_indices = @transform_4, window_bounds = array<i64: 128, 128>}, {pipeline_mode = #tpu.pipeline_mode<synchronous>, transform_indices = @transform_5, window_bounds = array<i64: 1, 128>}, {pipeline_mode = #tpu.pipeline_mode<synchronous>, transform_indices = @transform_6, window_bounds = array<i64: 1, 128>}, {pipeline_mode = #tpu.pipeline_mode<synchronous>, transform_indices = @transform_7, window_bounds = array<i64: 1, 128>}, {transform_indices = @transform_8, window_bounds = array<i64: 8, 128>}]} {
    %c0 = arith.constant 0 : index
    %c0_0 = arith.constant 0 : index
    %0 = vector.load %arg1[%c0, %c0_0] : memref<8x128xf32, #tpu.memory_space<vmem>>, vector<8x128xf32>
    %1 = arith.truncf %0 : vector<8x128xf32> to vector<8x128xbf16>
    %c0_1 = arith.constant 0 : index
    %c0_2 = arith.constant 0 : index
    %2 = vector.load %arg3[%c0_1, %c0_2] : memref<128x128xbf16, #tpu.memory_space<vmem>>, vector<128x128xbf16>
    %cst = arith.constant dense<0.000000e+00> : vector<8x128xf32>
    %3 = tpu.matmul %1, %2, %cst {dimension_numbers = #tpu.dot_dimension_numbers<[1], [0], [0], [1], [0, 0, 1, 1], [], []>} : vector<8x128xbf16>, vector<128x128xbf16>, vector<8x128xf32> -> vector<8x128xf32>
    %c0_3 = arith.constant 0 : index
    %c0_4 = arith.constant 0 : index
    %4 = vector.load %arg4[%c0_3, %c0_4] : memref<1x128xf32, #tpu.memory_space<vmem>>, vector<1x128xf32>
    %5 = vector.broadcast %4 : vector<1x128xf32> to vector<8x128xf32>
    %6 = arith.addf %3, %5 : vector<8x128xf32>
    %cst_5 = arith.constant 0.000000e+00 : f32
    %7 = vector.broadcast %cst_5 : f32 to vector<8x128xf32>
    %8 = arith.maximumf %6, %7 : vector<8x128xf32>
    %9 = arith.truncf %8 : vector<8x128xf32> to vector<8x128xbf16>
    %c0_6 = arith.constant 0 : index
    %c0_7 = arith.constant 0 : index
    %10 = vector.load %arg5[%c0_6, %c0_7] : memref<128x128xbf16, #tpu.memory_space<vmem>>, vector<128x128xbf16>
    %cst_8 = arith.constant dense<0.000000e+00> : vector<8x128xf32>
    %11 = tpu.matmul %9, %10, %cst_8 {dimension_numbers = #tpu.dot_dimension_numbers<[1], [0], [0], [1], [0, 0, 1, 1], [], []>} : vector<8x128xbf16>, vector<128x128xbf16>, vector<8x128xf32> -> vector<8x128xf32>
    %c0_9 = arith.constant 0 : index
    %c0_10 = arith.constant 0 : index
    %12 = vector.load %arg6[%c0_9, %c0_10] : memref<1x128xf32, #tpu.memory_space<vmem>>, vector<1x128xf32>
    %13 = vector.broadcast %12 : vector<1x128xf32> to vector<8x128xf32>
    %14 = arith.addf %11, %13 : vector<8x128xf32>
    %c0_11 = arith.constant 0 : index
    %c0_12 = arith.constant 0 : index
    %15 = vector.load %arg2[%c0_11, %c0_12] : memref<8x128xf32, #tpu.memory_space<vmem>>, vector<8x128xf32>
    %16 = arith.addf %14, %15 : vector<8x128xf32>
    %c0_13 = arith.constant 0 : index
    %c0_14 = arith.constant 0 : index
    %17 = vector.load %arg7[%c0_13, %c0_14] : memref<1x128xf32, #tpu.memory_space<vmem>>, vector<1x128xf32>
    %c0_15 = arith.constant 0 : index
    %c0_16 = arith.constant 0 : index
    %18 = vector.load %arg8[%c0_15, %c0_16] : memref<1x128xf32, #tpu.memory_space<vmem>>, vector<1x128xf32>
    %cst_17 = arith.constant dense<0.000000e+00> : vector<8xf32>
    %19 = vector.multi_reduction <add>, %16, %cst_17 [1] : vector<8x128xf32> to vector<8xf32>
    %20 = vector.shape_cast %19 : vector<8xf32> to vector<8x1xf32>
    %cst_18 = arith.constant 3.125000e-02 : f32
    %21 = vector.broadcast %cst_18 : f32 to vector<8x1xf32>
    %22 = arith.mulf %20, %21 : vector<8x1xf32>
    %23 = vector.broadcast %22 : vector<8x1xf32> to vector<8x128xf32>
    %24 = arith.subf %16, %23 : vector<8x128xf32>
    %25 = tpu.iota {dimensions = array<i32: 1>} : vector<8x128xi32>
    %c32_i32 = arith.constant 32 : i32
    %26 = vector.broadcast %c32_i32 : i32 to vector<8x128xi32>
    %27 = arith.cmpi slt, %25, %26 : vector<8x128xi32>
    %cst_19 = arith.constant 0.000000e+00 : f32
    %28 = vector.broadcast %cst_19 : f32 to vector<8x128xf32>
    %29 = arith.select %27, %24, %28 : vector<8x128xi1>, vector<8x128xf32>
    %30 = arith.mulf %29, %29 : vector<8x128xf32>
    %cst_20 = arith.constant dense<0.000000e+00> : vector<8xf32>
    %31 = vector.multi_reduction <add>, %30, %cst_20 [1] : vector<8x128xf32> to vector<8xf32>
    %32 = vector.shape_cast %31 : vector<8xf32> to vector<8x1xf32>
    %cst_21 = arith.constant 0.0322580636 : f32
    %33 = vector.broadcast %cst_21 : f32 to vector<8x1xf32>
    %34 = arith.mulf %32, %33 : vector<8x1xf32>
    %35 = math.sqrt %34 : vector<8x1xf32>
    %cst_22 = arith.constant 9.99999997E-7 : f32
    %36 = vector.broadcast %cst_22 : f32 to vector<8x1xf32>
    %37 = arith.addf %35, %36 : vector<8x1xf32>
    %38 = math.absf %18 : vector<1x128xf32>
    %39 = vector.broadcast %37 : vector<8x1xf32> to vector<8x128xf32>
    %40 = vector.broadcast %38 : vector<1x128xf32> to vector<8x128xf32>
    %41 = arith.addf %39, %40 : vector<8x128xf32>
    %42 = vector.broadcast %17 : vector<1x128xf32> to vector<8x128xf32>
    %43 = arith.mulf %42, %29 : vector<8x128xf32>
    %44 = tpu.reciprocal %41 {approx = true} : vector<8x128xf32> -> vector<8x128xf32>
    %45 = arith.mulf %43, %44 : vector<8x128xf32>
    %c0_23 = arith.constant 0 : index
    %c0_24 = arith.constant 0 : index
    %46 = vector.load %arg9[%c0_23, %c0_24] : memref<8x128xf32, #tpu.memory_space<vmem>>, vector<8x128xf32>
    tpu.vector_store %arg9[%c0_23, %c0_24], %45 {strides = array<i32>} : memref<8x128xf32, #tpu.memory_space<vmem>>, vector<8x128xf32>,
    return
  }
  func.func @transform_0(%arg0: i32) -> (i32, i32) {
    %c0_i32 = arith.constant 0 : i32
    %c0_i32_0 = arith.constant 0 : i32
    return %arg0, %c0_i32 : i32, i32
  }
  func.func @transform_1(%arg0: i32) -> (i32, i32) {
    %c0_i32 = arith.constant 0 : i32
    %c0_i32_0 = arith.constant 0 : i32
    return %arg0, %c0_i32 : i32, i32
  }
  func.func @transform_2(%arg0: i32) -> (i32, i32) {
    %c0_i32 = arith.constant 0 : i32
    %c0_i32_0 = arith.constant 0 : i32
    %c0_i32_1 = arith.constant 0 : i32
    return %c0_i32, %c0_i32_0 : i32, i32
  }
  func.func @transform_3(%arg0: i32) -> (i32, i32) {
    %c0_i32 = arith.constant 0 : i32
    %c0_i32_0 = arith.constant 0 : i32
    %c0_i32_1 = arith.constant 0 : i32
    return %c0_i32, %c0_i32_0 : i32, i32
  }
  func.func @transform_4(%arg0: i32) -> (i32, i32) {
    %c0_i32 = arith.constant 0 : i32
    %c0_i32_0 = arith.constant 0 : i32
    %c0_i32_1 = arith.constant 0 : i32
    return %c0_i32, %c0_i32_0 : i32, i32
  }
  func.func @transform_5(%arg0: i32) -> (i32, i32) {
    %c0_i32 = arith.constant 0 : i32
    %c0_i32_0 = arith.constant 0 : i32
    %c0_i32_1 = arith.constant 0 : i32
    return %c0_i32, %c0_i32_0 : i32, i32
  }
  func.func @transform_6(%arg0: i32) -> (i32, i32) {
    %c0_i32 = arith.constant 0 : i32
    %c0_i32_0 = arith.constant 0 : i32
    %c0_i32_1 = arith.constant 0 : i32
    return %c0_i32, %c0_i32_0 : i32, i32
  }
  func.func @transform_7(%arg0: i32) -> (i32, i32) {
    %c0_i32 = arith.constant 0 : i32
    %c0_i32_0 = arith.constant 0 : i32
    %c0_i32_1 = arith.constant 0 : i32
    return %c0_i32, %c0_i32_0 : i32, i32
  }
  func.func @transform_8(%arg0: i32) -> (i32, i32) {
    %c0_i32 = arith.constant 0 : i32
    %c0_i32_0 = arith.constant 0 : i32
    return %arg0, %c0_i32 : i32, i32
  }
}

</mosaic_0001>

<bundles_post_ra>
// kernel: tpu_custom_call.1
= control target key start
LH: loop header
LB: loop body
LE: loop exit
PB: predicated region body
PF: predicated region fallthrough
CT: control target
= control target key end

     0   :  { %s1451_s0 = inlined_call_operand.hbm [shape: f32[16,128], index: 0, kind: input, shape index: {}]   ;;  %s1452_s1 = inlined_call_operand.hbm [shape: f32[16,128], index: 1, kind: input, shape index: {}]   ;;  %s1453_s2 = inlined_call_operand.hbm [shape: bf16[128,128], index: 2, kind: input, shape index: {}]   ;;  %s1454_s3 = inlined_call_operand.vmem [shape: f32[1,128], index: 3, kind: input, shape index: {}]   ;;  %s1455_s4 = inlined_call_operand.hbm [shape: bf16[128,128], index: 4, kind: input, shape index: {}]   ;;  %s1456_s5 = inlined_call_operand.vmem [shape: f32[1,128], index: 5, kind: input, shape index: {}]   ;;  %s1457_s6 = inlined_call_operand.vmem [shape: f32[1,128], index: 6, kind: input, shape index: {}]   ;;  %s1458_s7 = inlined_call_operand.vmem [shape: f32[1,128], index: 7, kind: input, shape index: {}]   ;;  %s1459_s8 = inlined_call_operand.hbm [shape: f32[16,128], index: 8, kind: output, shape index: {}]  }
   0x1   :  { %1467 = sst [smem:[#allocation19_spill]] %s1453_s2 }
   0x2   :  { %1468 = sst [smem:[#allocation20_spill]] %s1455_s4 }
   0x3   :  { %13 = vsyncpa [#allocation3], 0 }
   0x4   :  { %15 = vsyncpa [#allocation3 + $0x1], 0 }
   0x5   :  { %16 = vsyncpa [#allocation6], 0 }
   0x6   :  { %18 = vsyncpa [#allocation6 + $0x1], 0 }
   0x7   :  { %19 = vsyncpa [#allocation9], 0 }
   0x8   :  { %20 = vsyncpa [#allocation4], 0 }
   0x9   :  { %22 = vsyncpa [#allocation4 + $0x1], 0  ;;  %s1214_s27 = smov 0   ;;  %s1216_s28 = smov 0  }
   0xa   :  { %s1218_s29 = smov 0   ;;  %s1220_s30 = smov 0  }
   0xb LB: > { %1469 = sst [smem:[#allocation16_spill]] %s1154_s29  ;;  %s1235_s9 = sadd.s32 4294967295, %s1158_s30   ;;  %s1158_s30 = sphi %s1220_s30, %s1490_s30   ;;  %s1154_s29 = sphi %s1218_s29, %s1492_s29   ;;  %s1150_s28 = sphi %s1216_s28, %s1494_s28   ;;  %s1146_s27 = sphi %s1214_s27, %s1493_s27  }
   0xc   : > { %s782_s10 = sadd.s32 4294967294, %s1158_s30   ;;  %p48_p0 = scmp.ne.s32.totalorder %s1150_s28, %s1146_s27 }
   0xd   : > { %p1460_p1 = scmp.eq.s32.totalorder %s1235_s9, 0  ;;  %p230_p3 = scmp.eq.s32.totalorder %s782_s10, 1 }
   0xe   : > { %p783_p5 = scmp.ge.s32.totalorder %s1158_s30, 1  ;;  %p237_p7 = scmp.lt.s32.totalorder %s1158_s30, 3 }
   0xf   : > { %p1244_p4 = por %p1460_p1, %p48_p0  ;;  %p1249_p6 = por %p230_p3, %p48_p0 }
  0x10   : > { %p1254_p8 = pnand %p783_p5, %p237_p7  ;;  %s1160_s14 = smov [#allocation7]  }
  0x11   : > { %s1470_s11 = scalar_select %p1244_p4, 1, 0 }
  0x12   : > { %s1471_s12 = scalar_select %p1249_p6, 1, 0 }
  0x13   : > { %s1472_s13 = scalar_select %p1254_p8, 1, 0 }
  0x14   : > { %s249_s15 = sshll.u32 %s1160_s14, 4  ;;  %p892_p9 = pneg %p1254_p8  ;;  %s250_s15 = int_to_ptr.vmem [resolvable:$true] %s249_s15 }
  0x15   : > { %s1161_s17 = smov [#allocation8]   ;;  %s985_s19 = scalar_lea.vmem %s250_s15, 1024 }
  0x16   : > { %p1263_p11 = pnand %p892_p9, %p1460_p1  ;;  %s265_s18 = sshll.u32 %s1161_s17, 4  ;;  %s266_s18 = int_to_ptr.vmem [resolvable:$true] %s265_s18 }
  0x17   : > { %p986_p13 = scmp.ne.s32.totalorder %s250_s15, %s985_s19  ;;  %p993_p5 = scmp.lt.s32.totalorder %s250_s15, %s250_s15 }
  0x18   : > { %p976_p12 = pneg %p1263_p11  ;;  %p994_p7 = scmp.lt.s32.totalorder %s985_s19, %s985_s19 }
  0x1a   : > { %p988_p0 = pnand %p986_p13, %p976_p12  ;;  %p995_p10 = por %p994_p7, %p993_p5 }
  0x1c   : > { %p989_p3 = pneg %p988_p0 }
  0x1e   : > { %p996_p9 = pnand %p995_p10, %p989_p3 }
  0x20   : > { %999 = shalt.err (!%p996_p9)
}
  0x21   : > { %s1162_s20 = smov 64   ;;  %s1163_s21 = smov 4  }
  0x22   : > { %s1474_s2 = sld [smem:[#allocation19_spill]]  ;;  %s1011_s24 = scalar_lea.vmem %s266_s18, 1024 }
  0x23   : > { %p1012_p1 = scmp.ne.s32.totalorder %s266_s18, %s1011_s24  ;;  %p1019_p2 = scmp.lt.s32.totalorder %s266_s18, %s266_s18 }
  0x24   : > { %p1020_p6 = scmp.lt.s32.totalorder %s1011_s24, %s1011_s24 }
  0x25   : > { %p1014_p13 = pnand %p1012_p1, %p976_p12 }
  0x26   : > { %p1021_p5 = por %p1020_p6, %p1019_p2 }
  0x27   : > { %p1015_p0 = pneg %p1014_p13 }
  0x28   : > { %895 = dma.hbm_to_vmem [thread:$0]  (!%p1263_p11), %s1474_s2, 1024, %s250_s15, [#allocation6], %s1162_s20, %s1162_s20, %s1163_s21  }
  0x29   : > { %p1022_p10 = pnand %p1021_p5, %p1015_p0 }
  0x2b   : > { %1025 = shalt.err (!%p1022_p10)
}
  0x2c   : > { %s1475_s4 = sld [smem:[#allocation20_spill]]  ;;  %s1286_s10 = sadd.s32 1, %s1158_s30  }
  0x2d   : > { %1476 = sst [smem:[#allocation17_spill]] %s1286_s10  ;;  %s35_s14 = sadd.s32 1, %s1154_s29 }
  0x2e   : > { %s32_s15 = ssub.s32 %s1158_s30, %s1286_s10  ;;  %p42_p1 = scmp.ne.s32.totalorder %s1154_s29, %s1150_s28 }
  0x2f   : > { %p33_p2 = scmp.eq.s32.totalorder %s32_s15, 0  ;;  %p43_p6 = scmp.eq.s32.totalorder %s1158_s30, 0 }
  0x30   : > { %p1477_p12 = scmp.eq.s32.totalorder %s1235_s9, 1  ;;  %p912_p7 = scmp.lt.s32.totalorder %s1158_s30, 2 }
  0x31   : > { %s1302_s17 = scalar_select %p33_p2, %s1154_s29, %s35_s14  }
  0x32   : > { %898 = dma.hbm_to_vmem [thread:$0]  (!%p1263_p11), %s1475_s4, 1024, %s266_s18, [#allocation9], %s1162_s20, %s1162_s20, %s1163_s21  }
  0x33   : > { %p1296_p3 = por %p1477_p12, %p42_p1  ;;  %1479 = sst [smem:[#allocation18_spill]] %s1302_s17 }
  0x34   : > { %p44_p9 = por %p43_p6, %p42_p1  ;;  %s288_s19 = sand.u32 1, %s1154_s29  }
  0x35   : > { %s1478_s16 = scalar_select %p1296_p3, 1, 0 }
  0x36   : > { %s1305_s18 = sshll.u32 %s288_s19, 3  ;;  %s788_s20 = sshll.u32 %s1158_s30, 7 }
  0x37   : > { %s1311_s23 = scalar_lea.hbm %s1451_s0, %s788_s20  ;;  %s292_s24 = scalar_lea.vmem [#allocation2], %s1305_s18 }
  0x38   : > { %s299_s25 = sshll.u32 %s292_s24, 4  ;;  %p1316_p11 = pnand %p912_p7, %p44_p9  ;;  %s1314_s25 = int_to_ptr.vmem [resolvable:$true] %s299_s25 }
  0x39   : > { %s1323_s2 = scalar_lea.hbm %s1452_s1, %s788_s20  ;;  %s306_s21 = sand.u32 1, %s1158_s30  }
  0x3a   : > { %s289_s22 = scalar_lea.sflag [#allocation3], %s288_s19  ;;  %s1026_s4 = scalar_lea.hbm %s1311_s23, 128 }
  0x3b   : > { %p1027_p13 = scmp.ne.s32.totalorder %s1311_s23, %s1026_s4  ;;  %p1028_p0 = pneg %p1316_p11 }
  0x3c   : > { %s1031_s29 = scalar_lea.hbm %s1451_s0, 256  ;;  %p1032_p1 = scmp.lt.s32.totalorder %s1311_s23, %s1451_s0 }
  0x3d   : > { %p1029_p5 = pnand %p1028_p0, %p1027_p13  ;;  %p1033_p2 = scmp.lt.s32.totalorder %s1031_s29, %s1026_s4 }
  0x3f   : > { %p1030_p10 = pneg %p1029_p5  ;;  %p1034_p6 = por %p1033_p2, %p1032_p1 }
  0x41   : > { %p1035_p12 = pnand %p1034_p6, %p1030_p10 }
  0x43   : > { %1038 = shalt.err (!%p1035_p12)
}
  0x44   : > { %s1039_s19 = scalar_lea.vmem %s1314_s25, 128  ;;  %s1164_s17 = smov [#allocation2]  }
  0x45   : > { %p1040_p7 = scmp.ne.s32.totalorder %s1314_s25, %s1039_s19  ;;  %s1044_s20 = sshll.u32 %s1164_s17, 4  ;;  %s1045_s20 = int_to_ptr.vmem [resolvable:$false] %s1044_s20 }
  0x46   : > { %s1046_s15 = scalar_lea.vmem %s1045_s20, 256  ;;  %p1047_p5 = scmp.lt.s32.totalorder %s1314_s25, %s1045_s20 }
  0x47   : > { %p1042_p9 = pnand %p1040_p7, %p1028_p0  ;;  %p1048_p3 = scmp.lt.s32.totalorder %s1046_s15, %s1039_s19 }
  0x49   : > { %p1043_p13 = pneg %p1042_p9  ;;  %p1049_p4 = por %p1048_p3, %p1047_p5 }
  0x4b   : > { %p1050_p1 = pnand %p1049_p4, %p1043_p13 }
  0x4d   : > { %1053 = shalt.err (!%p1050_p1)
}
  0x4e   : > { %902 = dma.hbm_to_vmem [thread:$0]  (!%p1316_p11), %s1311_s23, 128, %s1314_s25, %s289_s22  }
  0x4f   : > { %s310_s4 = scalar_lea.vmem [#allocation5], %s1305_s18  ;;  %s307_s10 = scalar_lea.sflag [#allocation6], %s306_s21 }
  0x50   : > { %s317_s29 = sshll.u32 %s310_s4, 4  ;;  %s1054_s24 = scalar_lea.hbm %s1323_s2, 128  ;;  %s318_s29 = int_to_ptr.vmem [resolvable:$true] %s317_s29 }
  0x51   : > { %p1055_p3 = scmp.ne.s32.totalorder %s1323_s2, %s1054_s24  ;;  %s1059_s17 = scalar_lea.hbm %s1452_s1, 256 }
  0x52   : > { %p1060_p2 = scmp.lt.s32.totalorder %s1323_s2, %s1452_s1  ;;  %p1061_p6 = scmp.lt.s32.totalorder %s1059_s17, %s1054_s24 }
  0x53   : > { %p1057_p4 = pnand %p1055_p3, %p1028_p0 }
  0x54   : > { %p1062_p12 = por %p1061_p6, %p1060_p2 }
  0x55   : > { %p1058_p10 = pneg %p1057_p4 }
  0x57   : > { %p1063_p7 = pnand %p1062_p12, %p1058_p10 }
  0x59   : > { %1066 = shalt.err (!%p1063_p7)
}
  0x5a   : > { %s1067_s18 = scalar_lea.vmem %s318_s29, 128  ;;  %s1165_s23 = smov [#allocation5]  }
  0x5b   : > { %p1068_p9 = scmp.ne.s32.totalorder %s318_s29, %s1067_s18  ;;  %s1072_s25 = sshll.u32 %s1165_s23, 4  ;;  %s1073_s25 = int_to_ptr.vmem [resolvable:$false] %s1072_s25 }
  0x5c   : > { %s1074_s21 = scalar_lea.vmem %s1073_s25, 256  ;;  %p1075_p1 = scmp.lt.s32.totalorder %s318_s29, %s1073_s25 }
  0x5d   : > { %p1070_p13 = pnand %p1068_p9, %p1028_p0  ;;  %p1076_p3 = scmp.lt.s32.totalorder %s1074_s21, %s1067_s18 }
  0x5f   : > { %p1071_p5 = pneg %p1070_p13  ;;  %p1077_p4 = por %p1076_p3, %p1075_p1 }
  0x61   : > { %p1078_p8 = pnand %p1077_p4, %p1071_p5 }
  0x63   : > { %1081 = shalt.err (!%p1078_p8)
}
  0x64   : > { %905 = dma.hbm_to_vmem [thread:$0]  (!%p1316_p11), %s1323_s2, 128, %s318_s29, %s307_s10  }
  0x65   : > { %p1481_p10 = scmp.ne.s32.totalorder %s1472_s13, 0 }
  0x66   : > { %s1374_s22 = sand.u32 (!%p1481_p10), 1, %s1150_s28   ;;  %p1482_p0 = scmp.ne.s32.totalorder (!%p1481_p10), %s1470_s11, 0 }
  0x67   : > { %326 = sbr.rel (%p1481_p10) target bundleno = 884 (0x374), region = 52  ;;  %s1377_s4 = sshll.u32 (!%p1481_p10), %s1374_s22, 3 }
  0x68   : > { %s329_s24 = scalar_lea.sflag (!%p1481_p10), [#allocation3], %s1374_s22  ;;  %s332_s14 = scalar_lea.vmem (!%p1481_p10), [#allocation2], %s1377_s4 }
  0x6c   : > { %1125 = dma.done.wait (%p1482_p0), %s329_s24, 128  }
  0x6d   : > { %1127 = vsyncadd (%p1482_p0), %s329_s24, 4294967168  ;;  %s337_s2 = sand.u32 1, %s1235_s9   ;;  %s341_s26 = scalar_lea.vmem [#allocation5], %s1377_s4 }
  0x6e   : > { %s338_s13 = scalar_lea.sflag [#allocation6], %s337_s2 }
  0x6f   : > { %1129 = dma.done.wait (%p1482_p0), %s338_s13, 128  }
  0x70   : > { %1131 = vsyncadd (%p1482_p0), %s338_s13, 4294967168  ;;  %p1483_p8 = scmp.eq.s32.totalorder %s1235_s9, 0 }
  0x72   : > { %1133 = dma.done.wait (%p1483_p8), [#allocation6], 1024   ;;  %p1484_p11 = pmov %p1483_p8 }
  0x73   : > { %p1485_p2 = pmov %p1483_p8 }
  0x74   : > { %1135 = vsyncadd (%p1484_p11), [#allocation6], 4294966272 }
  0x75   : > { %1137 = dma.done.wait (%p1485_p2), [#allocation9], 1024   ;;  %p1486_p6 = pmov %p1485_p2 }
  0x76   : > { %v1166_v0 = vmov 0.0   ;;  %vm1167_vm0 = vmmov 0   ;;  %v954_v1 = vld [vmem:[#allocation7 + $0x38] sm:$0xff]   ;;  %v955_v2 = vld [vmem:[#allocation7 + $0x30] sm:$0xff]   ;;  %v956_v3 = vld [vmem:[#allocation7 + $0x28] sm:$0xff]   ;;  %v622_v35 = vlaneseq  ;;  %s817_s23 = sshll.u32 %s1235_s9, 7 }
  0x77   : > { %1139 = vsyncadd (%p1486_p6), [#allocation9], 4294966272  ;;  %838 = vmatprep.subr.bf16.mxu0 %v1166_v0  ;;  %854 = vmatprep.mubr.msk.bf16.mxu0 %vm1167_vm0, %v1166_v0  ;;  %v962_v4 = vld [vmem:[#allocation8 + $0x38] sm:$0xff]   ;;  %v957_v5 = vld [vmem:[#allocation7 + $0x20] sm:$0xff]   ;;  %s386_s25 = scalar_lea.vmem [#allocation10], %s1377_s4  ;;  %s668_s2 = scalar_lea.hbm %s1459_s8, %s817_s23 }
  0x78   : > { %858 = vmatprep.subr.bf16.mxu1 %v1166_v0  ;;  %874 = vmatprep.mubr.msk.bf16.mxu1 %vm1167_vm0, %v1166_v0  ;;  %v963_v6 = vld [vmem:[#allocation8 + $0x30] sm:$0xff]   ;;  %v958_v7 = vld [vmem:[#allocation7 + $0x18] sm:$0xff]   ;;  %v964_v8 = vld [vmem:[#allocation8 + $0x28] sm:$0xff]   ;;  %v623_v36 = vand.u32 127, %v622_v35  ;;  %v641_v44 = vshrl.u32 %v622_v35, 7  ;;  %s670_s21 = sshll.u32 %s386_s25, 4  ;;  %s671_s21 = int_to_ptr.vmem [resolvable:$true] %s670_s21 }
  0x79   : > { %839 = vmatpush3.bf16.msra.mxu0 %v954_v1  ;;  %859 = vmatpush3.bf16.msra.mxu1 %v962_v4  ;;  %v959_v9 = vld [vmem:[#allocation7 + $0x10] sm:$0xff]   ;;  %v965_v10 = vld [vmem:[#allocation8 + $0x20] sm:$0xff]   ;;  %v960_v11 = vld [vmem:[#allocation7 + $0x8] sm:$0xff]   ;;  %s657_s13 = scalar_lea.sflag [#allocation4], %s1374_s22  ;;  %p1487_p7 = scmp.ne.s32.totalorder %s1478_s16, 0 }
  0x7a   : > { %840 = vmatprep.subr.bf16.mxu0 %v1166_v0  ;;  %860 = vmatprep.subr.bf16.mxu1 %v1166_v0  ;;  %v966_v12 = vld [vmem:[#allocation8 + $0x18] sm:$0xff]   ;;  %v961_v13 = vld [vmem:[#allocation7] sm:$0xff]   ;;  %v967_v15 = vld [vmem:[#allocation8 + $0x10] sm:$0xff]   ;;  %vm624_vm1 = vcmp.lt.s32.totalorder %v623_v36, 32  ;;  %v642_v47 = vsub.s32 0, %v641_v44  ;;  %s1168_s11 = smov [#allocation10]  }
  0x7b   : > { %v388_v14 = vld [vmem:[%s332_s14] sm:$0xff]  ;;  %v614_v29 = vld [vmem:[%s341_s26] sm:$0xff]  ;;  %s1082_s26 = scalar_lea.vmem %s671_s21, 128  ;;  %s1086_s29 = sshll.u32 %s1168_s11, 4  ;;  %s1087_s29 = int_to_ptr.vmem [resolvable:$false] %s1086_s29 }
  0x7c   : > { %v389_v16 = vpack.c.bf16 %v388_v14, %v388_v14  ;;  %v968_v17 = vld [vmem:[#allocation8 + $0x8] sm:$0xff]   ;;  %v969_v18 = vld [vmem:[#allocation8] sm:$0xff]   ;;  %p1083_p12 = scmp.ne.s32.totalorder %s671_s21, %s1082_s26  ;;  %s1088_s9 = scalar_lea.vmem %s1087_s29, 256 }
  0x7d   : > { %841 = vmatpush3.bf16.msra.mxu0 %v955_v2  ;;  %861 = vmatpush3.bf16.msra.mxu1 %v963_v6  ;;  %v797_v19 = vld [vmem:[%s1454_s3] ss:$0 sm:$0xff]  ;;  %p1089_p5 = scmp.lt.s32.totalorder %s671_s21, %s1087_s29  ;;  %p1090_p1 = scmp.lt.s32.totalorder %s1088_s9, %s1082_s26 }
  0x7e   : > { %842 = vmatprep.subr.bf16.mxu0 %v1166_v0  ;;  %862 = vmatprep.subr.bf16.mxu1 %v1166_v0  ;;  %v806_v27 = vld [vmem:[%s1456_s5] ss:$0 sm:$0xff]  ;;  %p1084_p9 = pnand %p1083_p12, %p1487_p7 }
  0x7f   : > { %v617_v45 = vld [vmem:[%s1458_s7] sm:$0x1]  ;;  %p1091_p3 = por %p1090_p1, %p1089_p5 }
  0x80   : > { %v638_v46 = vand.u32 2147483647, %v617_v45  ;;  %v815_v56 = vld [vmem:[%s1457_s6] ss:$0 sm:$0xff]  ;;  %p1085_p13 = pneg %p1084_p9 }
  0x81   : > { %843 = vmatpush3.bf16.msra.mxu0 %v956_v3  ;;  %863 = vmatpush3.bf16.msra.mxu1 %v964_v8 }
  0x82   : > { %844 = vmatprep.subr.bf16.mxu0 %v1166_v0  ;;  %864 = vmatprep.subr.bf16.mxu1 %v1166_v0  ;;  %v643_v51 = vrot.slane %v638_v46, %v642_v47  ;;  %p1092_p4 = pnand %p1091_p3, %p1085_p13 }
  0x85   : > { %845 = vmatpush3.bf16.msra.mxu0 %v957_v5  ;;  %865 = vmatpush3.bf16.msra.mxu1 %v965_v10 }
  0x86   : > { %846 = vmatprep.subr.bf16.mxu0 %v1166_v0  ;;  %866 = vmatprep.subr.bf16.mxu1 %v1166_v0 }
  0x89   : > { %847 = vmatpush3.bf16.msra.mxu0 %v958_v7  ;;  %867 = vmatpush3.bf16.msra.mxu1 %v966_v12 }
  0x8a   : > { %848 = vmatprep.subr.bf16.mxu0 %v1166_v0  ;;  %868 = vmatprep.subr.bf16.mxu1 %v1166_v0 }
  0x8d   : > { %849 = vmatpush3.bf16.msra.mxu0 %v959_v9  ;;  %869 = vmatpush3.bf16.msra.mxu1 %v967_v15 }
  0x8e   : > { %850 = vmatprep.subr.bf16.mxu0 %v1166_v0  ;;  %870 = vmatprep.subr.bf16.mxu1 %v1166_v0 }
  0x91   : > { %851 = vmatpush3.bf16.msra.mxu0 %v960_v11  ;;  %871 = vmatpush3.bf16.msra.mxu1 %v968_v17 }
  0x92   : > { %852 = vmatprep.subr.bf16.mxu0 %v1166_v0  ;;  %872 = vmatprep.subr.bf16.mxu1 %v1166_v0 }
  0x95   : > { %853 = vmatpush3.bf16.msra.mxu0 %v961_v13  ;;  %873 = vmatpush3.bf16.msra.mxu1 %v969_v18 }
  0x98   : > { %855 = vmatmul.mubr.bf16.vlgmr.msra.gmra.mxu0 %v389_v16 }
 0x158   : > { %v495_v20 = vpop.f32.mrf.mxu0 }
 0x159   : > { %v496_v21 = vadd.f32 %v797_v19, %v495_v20 }
 0x15a   : > { %v856_v22 = vpop.f32.mrf.mxu0 }
 0x15b   : > { %v501_v23 = vmax.f32 %v496_v21, 0.0 }
 0x15c   : > { %v498_v24 = vpop.f32.mrf.mxu0 }
 0x15d   : > { %v502_v25 = vpack.c.bf16 %v501_v23, %v501_v23 }
 0x15e   : > { %v857_v26 = vpop.f32.mrf.mxu0 }
 0x15f   : > { %875 = vmatmul.mubr.bf16.vlgmr.msra.gmra.mxu1 %v502_v25 }
 0x21f   : > { %v608_v28 = vpop.f32.mrf.mxu1 }
 0x220   : > { %v609_v30 = vadd.f32 %v806_v27, %v608_v28 }
 0x221   : > { %v876_v31 = vpop.f32.mrf.mxu1 }
 0x222   : > { %v615_v32 = vadd.f32 %v614_v29, %v609_v30 }
 0x223   : > { %v611_v33 = vpop.f32.mrf.mxu1 }
 0x224   : > { %618 = vadd.xlane.f32.xlu0 %v615_v32 }
 0x225   : > { %v877_v34 = vpop.f32.mrf.mxu1 }
 0x2ad   : > { %v619_v37 = vpop.xlane.xlu0 %618 }
 0x2ae   : > { %v620_v38 = vmul.f32 0.03125, %v619_v37 }
 0x2b0   : > { %v621_v39 = vsub.f32 %v615_v32, %v620_v38 }
 0x2b2   : > { %v625_v40 = vsel %vm624_vm1, %v621_v39, 0.0 }
 0x2b3   : > { %v626_v41 = vmul.f32 %v625_v40, %v625_v40  ;;  %v652_v57 = vmul.f32 %v815_v56, %v625_v40 }
 0x2b5   : > { %627 = vadd.xlane.f32.xlu0 %v626_v41 }
 0x33e   : > { %v628_v42 = vpop.xlane.xlu0 %627 }
 0x33f   : > { %v629_v43 = vmul.f32 0.032258064, %v628_v42 }
 0x341   : > { %970 = vrsqrt.f32 %v629_v43  ;;  %vm632_vm2 = vcmp.eq.f32.partialorder %v629_v43, inf  ;;  %v635_v50 = vand.u32 2147483648, %v629_v43  ;;  %vm634_vm3 = vcmp.eq.f32.partialorder %v629_v43, 0.0 }
 0x34e   : > { %v971_v48 = vpop.eup %970 }
 0x34f   : > { %v631_v49 = vmul.f32 %v971_v48, %v629_v43 }
 0x351   : > { %v633_v52 = vsel %vm632_vm2, %v629_v43, %v631_v49 }
 0x352   : > { %v636_v53 = vsel %vm634_vm3, %v635_v50, %v633_v52 }
 0x353   : > { %v637_v54 = vadd.f32 1e-06, %v636_v53 }
 0x355   : > { %v645_v55 = vadd.f32 %v643_v51, %v637_v54 }
 0x357   : > { %972 = vrcp.f32 %v645_v55 }
 0x364   : > { %v973_v58 = vpop.eup %972 }
 0x365   : > { %v654_v59 = vmul.f32 %v973_v58, %v652_v57 }
 0x367   : > { %655 = vst [vmem:[%s386_s25] sm:$0xff] %v654_v59 }
 0x368   : > { %1095 = shalt.err (!%p1092_p4)
}
 0x369   : > { %s1096_s4 = scalar_lea.hbm %s668_s2, 128  ;;  %s1100_s19 = scalar_lea.hbm %s1459_s8, 256 }
 0x36a   : > { %p1097_p10 = scmp.ne.s32.totalorder %s668_s2, %s1096_s4  ;;  %p1101_p11 = scmp.lt.s32.totalorder %s668_s2, %s1459_s8 }
 0x36b   : > { %p1102_p2 = scmp.lt.s32.totalorder %s1100_s19, %s1096_s4 }
 0x36c   : > { %p1098_p0 = pnand %p1097_p10, %p1487_p7 }
 0x36d   : > { %p1103_p6 = por %p1102_p2, %p1101_p11 }
 0x36e   : > { %p1099_p8 = pneg %p1098_p0 }
 0x370   : > { %p1104_p12 = pnand %p1103_p6, %p1099_p8 }
 0x372   : > { %1107 = shalt.err (!%p1104_p12)
}
 0x373   : > { %890 = dma.vmem_to_hbm [thread:$0]  (%p1487_p7), %s671_s21, 128, %s668_s2, %s657_s13  }
 0x374 PF: > { %s682_s15 = sand.u32 1, %s1146_s27   ;;  %p1488_p9 = scmp.ne.s32.totalorder %s1471_s12, 0 }
 0x375   : > { %p1489_p13 = scmp.ge.s32.totalorder %s1158_s30, 2  ;;  %s683_s18 = scalar_lea.sflag [#allocation4], %s682_s15 }
 0x377   : > { %p907_p5 = pnand %p1489_p13, %p1488_p9 }
 0x379   : > { %p908_p1 = pneg %p907_p5 }
 0x37b   : > { %1141 = dma.done.wait (%p908_p1), %s683_s18, 128  }
 0x37c   : > { %1143 = vsyncadd (%p908_p1), %s683_s18, 4294967168  ;;  %s1490_s30 = sld [smem:[#allocation17_spill]]  ;;  %s1493_s27 = smov %s1150_s28 }
 0x37d   : > { %s1491_s23 = sld [smem:[#allocation16_spill]] }
 0x37e   : > { %s1492_s29 = sld [smem:[#allocation18_spill]] }
 0x382   : > { %p25_p3 = scmp.ge.s32.totalorder %s1490_s30, 4  }
 0x383   : > { %s1494_s28 = smov %s1491_s23 }
 0x384   :  { %27 = sbr.rel (!%p25_p3) target bundleno = 11 (0xb), region = 118 }
 0x389   :  { %688 = vsyncpa [#allocation3], 1 }
 0x38a   :  { %690 = vsyncpa [#allocation3 + $0x1], 1 }
 0x38b   :  { %691 = vsyncpa [#allocation6], 1 }
 0x38c   :  { %693 = vsyncpa [#allocation6 + $0x1], 1 }
 0x38d   :  { %694 = vsyncpa [#allocation9], 1 }
 0x38e   :  { %695 = vsyncpa [#allocation4], 1 }
 0x38f   :  { %697 = vsyncpa [#allocation4 + $0x1], 1 }

</bundles_post_ra>
